<compile_context>
chip_gen: v7x
topology: tpu7x:2x2x1
jax: 0.10.0
libtpu: 0.0.40
codegen_flags: <defaults>
</compile_context>

<pallas_src>
import jax
import jax.numpy as jnp
from jax.experimental import pallas as pl
from jax.experimental.pallas import tpu as pltpu

F_IN = 42      # input features
H1 = 20        # layer-1 width (padded to 24 rows in the slab)
H2 = 10        # layer-2 width (padded to 16)
N_CLS = 4      # classes (padded to 8)

# --- packed parameter slab layout: one (48, 128) f32 array, 8-sublane aligned ---
#   rows  0:24 : W1 (20,42) at [0:20, 0:42],  b1 at [0:20, 42]   (rows 20:24 zero)
#   rows 24:40 : W2 (10,20) at [24:34, 0:20], b2 at [24:34, 24]  (pad rows/cols zero)
#   rows 40:48 : W3 ( 4,10) at [40:44, 0:10], b3 at [40:44, 16]  (pad rows/cols zero)
SLAB_SHAPE = (48, 128)


def keypoint_mlp_kernel(p_ref, x_ref, o_ref):
    x = x_ref[...]                               # (block_b, 42), batch-major as in HBM

    # 8-sublane-aligned weight/bias slices (zero-padded rows/cols are harmless).
    w1 = p_ref[0:24, 0:F_IN]                     # (24, 42)
    b1 = p_ref[0:24, F_IN:F_IN + 1]              # (24, 1)
    w2 = p_ref[24:40, 0:24]                      # (16, 24)
    b2 = p_ref[24:40, 24:25]                     # (16, 1)
    w3 = p_ref[40:48, 0:16]                      # (8, 16)
    b3 = p_ref[40:48, 16:17]                     # (8, 1)

    # Layer 1: contract the feature axis of the batch-major tile directly
    # (rhs-transposed contraction on the MXU) -> batch lands on the lane axis
    # without any separate transpose pass over x.
    h1 = jnp.einsum("of,bf->ob", w1, x, preferred_element_type=jnp.float32)
    h1 = jnp.maximum(h1 + b1, 0.0)                                               # (24, bb)

    # Layers 2 / 3: plain MKN matmuls, f32 accumulation.
    h2 = jnp.maximum(jnp.dot(w2, h1, preferred_element_type=jnp.float32) + b2, 0.0)  # (16, bb)
    logits = jnp.dot(w3, h2, preferred_element_type=jnp.float32) + b3                # (8, bb)

    # Softmax over the 4 real class rows (padded rows 4:8 are ignored).
    l4 = logits[0:N_CLS, :]                                                      # (4, bb)
    m = jnp.maximum(jnp.maximum(l4[0:1], l4[1:2]),
                    jnp.maximum(l4[2:3], l4[3:4]))                               # (1, bb)
    e = jnp.exp(l4 - m)                                                          # (4, bb)
    denom = (e[0:1] + e[1:2]) + (e[2:3] + e[3:4])                                # (1, bb)
    o_ref[...] = (e / denom).astype(o_ref.dtype)          # exact normalization


def pack_params(w1, b1, w2, b2, w3, b3):
    """Pack PyTorch-convention weights (out,in) and biases (out,) into one aligned slab."""
    slab = jnp.zeros(SLAB_SHAPE, jnp.float32)
    slab = slab.at[0:20, 0:42].set(w1.astype(jnp.float32))
    slab = slab.at[0:20, 42].set(b1.astype(jnp.float32))
    slab = slab.at[24:34, 0:20].set(w2.astype(jnp.float32))
    slab = slab.at[24:34, 24].set(b2.astype(jnp.float32))
    slab = slab.at[40:44, 0:10].set(w3.astype(jnp.float32))
    slab = slab.at[40:44, 16].set(b3.astype(jnp.float32))
    return slab


def _choose_block_b(B, max_block_b=4096):
    """Right-sized batch tile: exact block for small B; >=2 large blocks for big B."""
    if B <= 256:
        return B                                   # single exact block (full-dim escape)
    half = pl.cdiv(B, 2)
    return min(pl.cdiv(half, 128) * 128, max_block_b)   # multiple of 128, >=2 blocks


def keypoint_model_forward(x, slab, *, max_block_b=4096):
    """x: (B, 42).  slab: packed (48,128) parameter slab.  Returns (B, 4) softmax probs."""
    B, f = x.shape
    assert f == F_IN
    block_b = _choose_block_b(B, max_block_b)
    n_blocks = pl.cdiv(B, block_b)

    out_t = pl.pallas_call(
        keypoint_mlp_kernel,
        out_shape=jax.ShapeDtypeStruct((N_CLS, B), jnp.float32),
        grid=(n_blocks,),
        in_specs=[
            # parameter slab: constant block index -> DMA'd once, VMEM-resident
            pl.BlockSpec(SLAB_SHAPE, lambda i: (0, 0)),
            # batch tile of x read directly from its native (B, 42) layout
            pl.BlockSpec((block_b, F_IN), lambda i: (i, 0)),
        ],
        out_specs=pl.BlockSpec((N_CLS, block_b), lambda i: (0, i)),
        compiler_params=pltpu.CompilerParams(
            dimension_semantics=("parallel",),        # batch tiles across v7x's 2 TCs
            vmem_limit_bytes=32 * 1024 * 1024,        # footprint is tiny; documents ceiling
        ),
    )(slab, x)

    # Only remaining wrapper op: flip the small (4, B) result to PyTorch's (B, 4).
    return out_t.T


def init_params(key):
    """PyTorch nn.Linear default init: U[-1/sqrt(fan_in), 1/sqrt(fan_in)], weight (out,in)."""
    dims = [(42, 20), (20, 10), (10, 4)]
    params = {}
    for i, (fan_in, fan_out) in enumerate(dims, start=1):
        key, kw, kb = jax.random.split(key, 3)
        bound = 1.0 / jnp.sqrt(float(fan_in))
        params[f"w{i}"] = jax.random.uniform(kw, (fan_out, fan_in), jnp.float32,
                                             minval=-bound, maxval=bound)
        params[f"b{i}"] = jax.random.uniform(kb, (fan_out,), jnp.float32,
                                             minval=-bound, maxval=bound)
    return params


if __name__ == "__main__":
    key = jax.random.PRNGKey(0)
    key, kx = jax.random.split(key)

    B = 8
    x = jax.random.normal(kx, (B, F_IN), jnp.float32)   # 42 keypoint features per sample
    params = init_params(key)
    slab = pack_params(params["w1"], params["b1"],
                       params["w2"], params["b2"],
                       params["w3"], params["b3"])

    out = keypoint_model_forward(x, slab)
    out = jax.block_until_ready(out)

    # Pure-JAX reference (PyTorch semantics: x @ W.T + b, softmax over classes)
    def ref(x, p):
        h1 = jnp.maximum(x @ p["w1"].T + p["b1"], 0.0)
        h2 = jnp.maximum(h1 @ p["w2"].T + p["b2"], 0.0)
        logits = h2 @ p["w3"].T + p["b3"]
        return jax.nn.softmax(logits, axis=-1)

    expected = ref(x, params)
    assert out.shape == (B, N_CLS)
    assert jnp.allclose(jnp.sum(out, axis=-1), 1.0, atol=1e-3)
    assert jnp.allclose(out, expected, atol=1e-3, rtol=1e-3)

    print("KERNEL_OK")
</pallas_src>

<mosaic_0001>
module attributes {stable_mosaic.version = 11 : i64} {
  func.func @keypoint_mlp_kernel(%arg0: i32, %arg1: memref<48x128xf32, #tpu.memory_space<vmem>>, %arg2: memref<8x42xf32, #tpu.memory_space<vmem>>, %arg3: memref<4x8xf32, #tpu.memory_space<vmem>>) attributes {dimension_semantics = [#tpu.dimension_semantics<parallel>], iteration_bounds = array<i64: 1>, scalar_prefetch = 0 : i64, scratch_operands = 0 : i64, tpu.core_type = #tpu.core_type<tc>, window_params = [{pipeline_mode = #tpu.pipeline_mode<synchronous>, transform_indices = @transform_0, window_bounds = array<i64: 48, 128>}, {transform_indices = @transform_1, window_bounds = array<i64: 8, 42>}, {transform_indices = @transform_2, window_bounds = array<i64: 4, 8>}]} {
    %c0 = arith.constant 0 : index
    %c0_0 = arith.constant 0 : index
    %0 = vector.load %arg2[%c0, %c0_0] : memref<8x42xf32, #tpu.memory_space<vmem>>, vector<8x42xf32>
    %c0_1 = arith.constant 0 : index
    %c0_2 = arith.constant 0 : index
    %1 = vector.load %arg1[%c0_1, %c0_2] : memref<48x128xf32, #tpu.memory_space<vmem>>, vector<24x42xf32>
    %c0_3 = arith.constant 0 : index
    %c42 = arith.constant 42 : index
    %2 = vector.load %arg1[%c0_3, %c42] : memref<48x128xf32, #tpu.memory_space<vmem>>, vector<24x1xf32>
    %c24 = arith.constant 24 : index
    %c0_4 = arith.constant 0 : index
    %3 = vector.load %arg1[%c24, %c0_4] : memref<48x128xf32, #tpu.memory_space<vmem>>, vector<16x24xf32>
    %c24_5 = arith.constant 24 : index
    %c24_6 = arith.constant 24 : index
    %4 = vector.load %arg1[%c24_5, %c24_6] : memref<48x128xf32, #tpu.memory_space<vmem>>, vector<16x1xf32>
    %c40 = arith.constant 40 : index
    %c0_7 = arith.constant 0 : index
    %5 = vector.load %arg1[%c40, %c0_7] : memref<48x128xf32, #tpu.memory_space<vmem>>, vector<8x16xf32>
    %c40_8 = arith.constant 40 : index
    %c16 = arith.constant 16 : index
    %6 = vector.load %arg1[%c40_8, %c16] : memref<48x128xf32, #tpu.memory_space<vmem>>, vector<8x1xf32>
    "tpu.trace_start"() <{level = 10 : i32, message = "of,bf->ob"}> : () -> ()
    %cst = arith.constant dense<0.000000e+00> : vector<24x8xf32>
    %7 = tpu.matmul %1, %0, %cst {dimension_numbers = #tpu.dot_dimension_numbers<[1], [1], [0], [0], [0, 0, 1, 0], [], []>} : vector<24x42xf32>, vector<8x42xf32>, vector<24x8xf32> -> vector<24x8xf32>
    "tpu.trace_stop"() : () -> ()
    %8 = vector.broadcast %2 : vector<24x1xf32> to vector<24x8xf32>
    %9 = arith.addf %7, %8 : vector<24x8xf32>
    %cst_9 = arith.constant 0.000000e+00 : f32
    %10 = vector.broadcast %cst_9 : f32 to vector<24x8xf32>
    %11 = arith.maximumf %9, %10 : vector<24x8xf32>
    %cst_10 = arith.constant dense<0.000000e+00> : vector<16x8xf32>
    %12 = tpu.matmul %3, %11, %cst_10 {dimension_numbers = #tpu.dot_dimension_numbers<[1], [0], [0], [1], [0, 0, 1, 1], [], []>} : vector<16x24xf32>, vector<24x8xf32>, vector<16x8xf32> -> vector<16x8xf32>
    %13 = vector.broadcast %4 : vector<16x1xf32> to vector<16x8xf32>
    %14 = arith.addf %12, %13 : vector<16x8xf32>
    %cst_11 = arith.constant 0.000000e+00 : f32
    %15 = vector.broadcast %cst_11 : f32 to vector<16x8xf32>
    %16 = arith.maximumf %14, %15 : vector<16x8xf32>
    %cst_12 = arith.constant dense<0.000000e+00> : vector<8x8xf32>
    %17 = tpu.matmul %5, %16, %cst_12 {dimension_numbers = #tpu.dot_dimension_numbers<[1], [0], [0], [1], [0, 0, 1, 1], [], []>} : vector<8x16xf32>, vector<16x8xf32>, vector<8x8xf32> -> vector<8x8xf32>
    %18 = vector.broadcast %6 : vector<8x1xf32> to vector<8x8xf32>
    %19 = arith.addf %17, %18 : vector<8x8xf32>
    %20 = vector.extract_strided_slice %19 {offsets = [0, 0], sizes = [4, 8], strides = [1, 1]} : vector<8x8xf32> to vector<4x8xf32>
    %21 = vector.extract_strided_slice %20 {offsets = [0, 0], sizes = [1, 8], strides = [1, 1]} : vector<4x8xf32> to vector<1x8xf32>
    %22 = vector.extract_strided_slice %20 {offsets = [1, 0], sizes = [1, 8], strides = [1, 1]} : vector<4x8xf32> to vector<1x8xf32>
    %23 = arith.maximumf %21, %22 : vector<1x8xf32>
    %24 = vector.extract_strided_slice %20 {offsets = [2, 0], sizes = [1, 8], strides = [1, 1]} : vector<4x8xf32> to vector<1x8xf32>
    %25 = vector.extract_strided_slice %20 {offsets = [3, 0], sizes = [1, 8], strides = [1, 1]} : vector<4x8xf32> to vector<1x8xf32>
    %26 = arith.maximumf %24, %25 : vector<1x8xf32>
    %27 = arith.maximumf %23, %26 : vector<1x8xf32>
    %28 = vector.broadcast %27 : vector<1x8xf32> to vector<4x8xf32>
    %29 = arith.subf %20, %28 : vector<4x8xf32>
    %30 = math.exp %29 : vector<4x8xf32>
    %31 = vector.extract_strided_slice %30 {offsets = [0, 0], sizes = [1, 8], strides = [1, 1]} : vector<4x8xf32> to vector<1x8xf32>
    %32 = vector.extract_strided_slice %30 {offsets = [1, 0], sizes = [1, 8], strides = [1, 1]} : vector<4x8xf32> to vector<1x8xf32>
    %33 = arith.addf %31, %32 : vector<1x8xf32>
    %34 = vector.extract_strided_slice %30 {offsets = [2, 0], sizes = [1, 8], strides = [1, 1]} : vector<4x8xf32> to vector<1x8xf32>
    %35 = vector.extract_strided_slice %30 {offsets = [3, 0], sizes = [1, 8], strides = [1, 1]} : vector<4x8xf32> to vector<1x8xf32>
    %36 = arith.addf %34, %35 : vector<1x8xf32>
    %37 = arith.addf %33, %36 : vector<1x8xf32>
    %38 = vector.broadcast %37 : vector<1x8xf32> to vector<4x8xf32>
    %39 = arith.divf %30, %38 : vector<4x8xf32>
    %c0_13 = arith.constant 0 : index
    %c0_14 = arith.constant 0 : index
    %40 = vector.load %arg3[%c0_13, %c0_14] : memref<4x8xf32, #tpu.memory_space<vmem>>, vector<4x8xf32>
    tpu.vector_store %arg3[%c0_13, %c0_14], %39 {strides = array<i32>} : memref<4x8xf32, #tpu.memory_space<vmem>>, vector<4x8xf32>,
    return
  }
  func.func @transform_0(%arg0: i32) -> (i32, i32) {
    %c0_i32 = arith.constant 0 : i32
    %c0_i32_0 = arith.constant 0 : i32
    %c0_i32_1 = arith.constant 0 : i32
    return %c0_i32, %c0_i32_0 : i32, i32
  }
  func.func @transform_1(%arg0: i32) -> (i32, i32) {
    %c0_i32 = arith.constant 0 : i32
    %c0_i32_0 = arith.constant 0 : i32
    return %arg0, %c0_i32 : i32, i32
  }
  func.func @transform_2(%arg0: i32) -> (i32, i32) {
    %c0_i32 = arith.constant 0 : i32
    %c0_i32_0 = arith.constant 0 : i32
    return %c0_i32, %arg0 : i32, i32
  }
}

</mosaic_0001>

<bundles_post_ra>
// kernel: tpu_custom_call.1
= control target key start
LH: loop header
LB: loop body
LE: loop exit
PB: predicated region body
PF: predicated region fallthrough
CT: control target
= control target key end

     0   :  { %7 = vsyncpa [#allocation3], 0  ;;  %s584_s0 = inlined_call_operand.hbm [shape: f32[48,128], index: 0, kind: input, shape index: {}]   ;;  %s585_s1 = inlined_call_operand.hbm [shape: f32[8,42], index: 1, kind: input, shape index: {}]   ;;  %s586_s2 = inlined_call_operand.hbm [shape: f32[4,8], index: 2, kind: output, shape index: {}]  }
   0x1   :  { %8 = vsyncpa [#allocation6], 0 }
   0x2   :  { %9 = vsyncpa [#allocation4], 0  ;;  %s516_s9 = smov [#allocation2]   ;;  %s444_s13 = scalar_lea.hbm %s584_s0, 768 }
   0x3   :  { %s15_s10 = sshll.u32 %s516_s9, 4  ;;  %p445_p0 = scmp.ne.s32.totalorder %s584_s0, %s444_s13  ;;  %s16_s10 = int_to_ptr.vmem [resolvable:$true] %s15_s10 }
   0x4   :  { %p448_p1 = scmp.lt.u32.totalorder %s444_s13, %s584_s0 }
   0x6   :  { %p450_p2 = pnand %p448_p1, %p445_p0 }
   0x8   :  { %453 = shalt.err (!%p450_p2)
}
   0x9   :  { %s454_s18 = scalar_lea.vmem %s16_s10, 768  ;;  %p459_p4 = scmp.lt.s32.totalorder %s16_s10, %s16_s10 }
   0xa   :  { %p455_p3 = scmp.ne.s32.totalorder %s16_s10, %s454_s18  ;;  %p460_p5 = scmp.lt.s32.totalorder %s454_s18, %s454_s18 }
   0xc   :  { %p461_p6 = por %p460_p5, %p459_p4 }
   0xe   :  { %p462_p7 = pnand %p461_p6, %p455_p3 }
  0x10   :  { %465 = shalt.err (!%p462_p7)
}
  0x11   :  { %s517_s19 = smov 128   ;;  %s518_s20 = smov 8  }
  0x12   :  { %21 = dma.hbm_to_vmem [thread:$0]  %s584_s0, 768, %s16_s10, [#allocation3], %s517_s19, %s517_s19, %s518_s20  }
  0x13   :  { %s519_s23 = smov [#allocation5]   ;;  %s466_s27 = scalar_lea.hbm %s585_s1, 128 }
  0x14   :  { %s28_s24 = sshll.u32 %s519_s23, 4  ;;  %p467_p8 = scmp.ne.s32.totalorder %s585_s1, %s466_s27  ;;  %s29_s24 = int_to_ptr.vmem [resolvable:$true] %s28_s24 }
  0x15   :  { %p470_p9 = scmp.lt.u32.totalorder %s466_s27, %s585_s1 }
  0x17   :  { %p472_p10 = pnand %p470_p9, %p467_p8 }
  0x19   :  { %475 = shalt.err (!%p472_p10)
}
  0x1a   :  { %s476_s4 = scalar_lea.vmem %s29_s24, 128  ;;  %p481_p12 = scmp.lt.s32.totalorder %s29_s24, %s29_s24 }
  0x1b   :  { %p477_p11 = scmp.ne.s32.totalorder %s29_s24, %s476_s4  ;;  %p482_p13 = scmp.lt.s32.totalorder %s476_s4, %s476_s4 }
  0x1d   :  { %p483_p0 = por %p482_p13, %p481_p12 }
  0x1f   :  { %p484_p1 = pnand %p483_p0, %p477_p11 }
  0x21   :  { %487 = shalt.err (!%p484_p1)
}
  0x22   :  { %31 = dma.hbm_to_vmem [thread:$0]  %s585_s1, 128, %s29_s24, [#allocation6]  }
  0x23   :  { %510 = dma.done.wait [#allocation3], 768  }
  0x24   :  { %511 = vsyncadd [#allocation3], 4294966528 }
  0x25   :  { %512 = dma.done.wait [#allocation6], 128  }
  0x26   :  { %513 = vsyncadd [#allocation6], 4294967168  ;;  %v520_v0 = vmov 0.0   ;;  %vm521_vm0 = vmmov 0   ;;  %v522_v1 = vmov 42   ;;  %vm60_vm1 = vcmask 343040  }
  0x27   :  { %389 = vmatprep.subr.mxu0 %v520_v0  ;;  %391 = vmatprep.mubr.msk.f32.mxu0 %vm521_vm0, %v520_v0  ;;  %v38_v2 = vld [vmem:[#allocation5] sm:$0xff]  ;;  %v39_v3 = vld [vmem:[#allocation2] sm:$0xff]  ;;  %v40_v5 = vld [vmem:[#allocation2 + $0x8] sm:$0xff]  ;;  %vm163_vm2 = vcmask 195584   ;;  %v523_v8 = vmov 24   ;;  %v524_v25 = vmov 0.0|0.0   ;;  %v331_v38 = vlaneseq }
  0x28   :  { %434 = vset.pattern.permute.xlu0 %v522_v1  ;;  %435 = vset.pattern.permute.xlu1 %v522_v1  ;;  %v41_v4 = vld [vmem:[#allocation2 + $0x10] sm:$0xff]  ;;  %v42_v6 = vld [vmem:[#allocation2 + $0x18] sm:$0xff]  ;;  %v43_v7 = vld [vmem:[#allocation2 + $0x20] sm:$0xff]  ;;  %v525_v27 = vmov 16   ;;  %vm250_vm3 = vcmask 130048   ;;  %s526_s1 = smov [#allocation7]  }
  0x29   :  { %390 = vmatpush3.xpose.msk.msra.mxu0 %vm60_vm1, %v38_v2  ;;  %47 = vperm.xlu0 %434, %v39_v3   ;;  %v44_v26 = vld [vmem:[#allocation2 + $0x28] sm:$0xff]  ;;  %v332_v43 = vshrl.u32 %v331_v38, 7  ;;  %s360_s6 = sshll.u32 %s526_s1, 4  ;;  %vm352_vm4 = vcmask 60416   ;;  %s361_s6 = int_to_ptr.vmem [resolvable:$true] %s360_s6 }
  0x2a   :  { %57 = vperm.xlu1 %435, %v41_v4   ;;  %406 = vmatprep.mubr.msk.f32.mxu1 %vm163_vm2, %v42_v6  ;;  %s488_s7 = scalar_lea.vmem %s361_s6, 64  ;;  %p493_p3 = scmp.lt.s32.totalorder %s361_s6, %s361_s6 }
  0x2b   :  { %v333_v46 = vsub.s32 0, %v332_v43  ;;  %p489_p2 = scmp.ne.s32.totalorder %s361_s6, %s488_s7  ;;  %p494_p4 = scmp.lt.s32.totalorder %s488_s7, %s488_s7 }
  0x2c   :  { %392 = vmatmul.mubr.msk.f32.vlgmr.msra.gmra.mrb[0].mxu0 %vm60_vm1, %v39_v3 }
  0x2d   :  { %394 = vmatprep.mubr.msk.f32.mxu0 %vm521_vm0, %v520_v0  ;;  %52 = vperm.xlu0 %434, %v40_v5   ;;  %p495_p5 = por %p494_p4, %p493_p3 }
  0x2e   :  { %436 = vset.pattern.permute.xlu1 %v523_v8 }
  0x2f   :  { %155 = vperm.xlu1 %436, %v42_v6   ;;  %p496_p6 = pnand %p495_p5, %p489_p2 }
  0x30   :  { %395 = vmatmul.mubr.msk.f32.gmra.mrb[2].mxu0 %vm60_vm1, %v40_v5 }
  0x31   :  { %397 = vmatprep.mubr.msk.f32.mxu0 %vm521_vm0, %v520_v0  ;;  %437 = vset.pattern.permute.xlu0 %v523_v8 }
  0x32   :  { %160 = vperm.xlu0 %437, %v43_v7  }
  0x33   :  { %438 = vset.pattern.permute.xlu1 %v525_v27 }
  0x34   :  { %398 = vmatmul.mubr.msk.f32.gmra.mrb[4].mxu0 %vm60_vm1, %v41_v4  ;;  %247 = vperm.xlu1 %438, %v44_v26  }
  0x36   :  { %439 = vset.pattern.permute.xlu0 %v525_v27 }
  0xa8   :  { %v48_v9 = vpop.permute.xlu0 %47 }
  0xa9   :  { %v58_v17 = vpop.permute.xlu1 %57 }
  0xac   :  { %v53_v13 = vpop.permute.xlu0 %52 }
  0xae   :  { %v156_v29 = vpop.permute.xlu1 %155 }
  0xb1   :  { %v161_v28 = vpop.permute.xlu0 %160 }
  0xb3   :  { %v248_v37 = vpop.permute.xlu1 %247 }
  0xff   :  { %v136_v10 = vpop.f32.mrb[0].mxu0 }
 0x100   :  { %v393_v11 = vpop.f32.mrb[1].mxu0  ;;  %v137_v12 = vadd.f32 %v136_v10, %v48_v9 }
 0x102   :  { %v150_v18 = vmax.f32 %v137_v12, 0.0 }
 0x103   :  { %v141_v14 = vpop.f32.mrb[2].mxu0 }
 0x104   :  { %v142_v15 = vadd.f32 %v141_v14, %v53_v13  ;;  %v396_v16 = vpop.f32.mrb[3].mxu0 }
 0x106   :  { %v151_v19 = vmax.f32 %v142_v15, 0.0 }
 0x107   :  { %v146_v20 = vpop.f32.mrb[4].mxu0 }
 0x108   :  { %v147_v21 = vadd.f32 %v146_v20, %v58_v17  ;;  %v399_v22 = vpop.f32.mrb[5].mxu0  ;;  %v416_v23 = vpack.c.bf16 %v151_v19, %v150_v18 }
 0x10a   :  { %v152_v24 = vmax.f32 %v147_v21, 0.0  ;;  %417 = vmatprep.subr.bf16.mxu1 %v416_v23 }
 0x10b   :  { %419 = vmatpush3.bf16.msra.mxu1 %v416_v23 }
 0x10c   :  { %404 = vmatprep.subr.mxu1 %v152_v24 }
 0x10f   :  { %405 = vmatpush3.msra.mxu1 %v152_v24 }
 0x110   :  { %407 = vmatmul.mubr.msk.f32.vlgmr.msra.gmra.mrb[0].mxu1 %vm163_vm2, %v43_v7  ;;  %420 = vmatprep.subr.bf16.mxu1 %v524_v25 }
 0x111   :  { %413 = vmatprep.mubr.msk.f32.mxu1 %vm521_vm0, %v520_v0 }
 0x1e3   :  { %v408_v30 = vpop.f32.mrb[0].mxu1 }
 0x1e4   :  { %v240_v31 = vadd.f32 %v408_v30, %v161_v28  ;;  %v234_v32 = vpop.f32.mrb[1].mxu1 }
 0x1e5   :  { %v235_v33 = vadd.f32 %v234_v32, %v156_v29 }
 0x1e6   :  { %v244_v34 = vmax.f32 %v240_v31, 0.0 }
 0x1e7   :  { %v243_v35 = vmax.f32 %v235_v33, 0.0 }
 0x1e9   :  { %v421_v36 = vpack.c.bf16 %v244_v34, %v243_v35 }
 0x1eb   :  { %422 = vmatpush3.bf16.msra.mxu1 %v421_v36 }
 0x1ee   :  { %414 = vmatmul.mubr.msk.f32.vlgmr.msra.gmra.mrb[2].mxu1 %vm250_vm3, %v44_v26 }
 0x2c1   :  { %v319_v39 = vpop.f32.mrb[2].mxu1 }
 0x2c2   :  { %v320_v40 = vadd.f32 %v319_v39, %v248_v37  ;;  %v415_v41 = vpop.f32.mrb[3].mxu1 }
 0x2c4   :  { %v324_v42 = vrot.slane %v320_v40, 1 }
 0x2c6   :  { %v326_v44 = vmax.f32 %v320_v40, %v324_v42 }
 0x2c8   :  { %v328_v45 = vrot.slane %v326_v44, 2 }
 0x2ca   :  { %v330_v47 = vmax.f32 %v326_v44, %v328_v45 }
 0x2cc   :  { %v334_v48 = vrot.slane %v330_v47, %v333_v46 }
 0x2ce   :  { %v335_v49 = vsub.f32 %v320_v40, %v334_v48 }
 0x2d0   :  { %v336_v50 = vmul.f32 1.442695, %v335_v49 }
 0x2d2   :  { %440 = vpow2.f32 %v336_v50 }
 0x2dc   :  { %v441_v51 = vpop.eup %440 }
 0x2dd   :  { %v339_v52 = vrot.slane %v441_v51, 1 }
 0x2df   :  { %v341_v53 = vadd.f32 %v441_v51, %v339_v52 }
 0x2e1   :  { %v343_v54 = vrot.slane %v341_v53, 2 }
 0x2e3   :  { %v345_v55 = vadd.f32 %v343_v54, %v341_v53 }
 0x2e5   :  { %v349_v56 = vrot.slane %v345_v55, %v333_v46 }
 0x2e7   :  { %442 = vrcp.f32 %v349_v56 }
 0x2f1   :  { %v443_v57 = vpop.eup %442 }
 0x2f2   :  { %v351_v58 = vmul.f32 %v443_v57, %v441_v51 }
 0x2f4   :  { %353 = vst.msk [vmem:[#allocation7] sm:$0xf] %vm352_vm4, %v351_v58 }
 0x2f5   :  { %499 = shalt.err (!%p496_p6)
}
 0x2f6   :  { %s500_s10 = scalar_lea.hbm %s586_s2, 64 }
 0x2f7   :  { %p501_p7 = scmp.ne.s32.totalorder %s586_s2, %s500_s10  ;;  %p504_p8 = scmp.lt.u32.totalorder %s500_s10, %s586_s2 }
 0x2f9   :  { %p506_p9 = pnand %p504_p8, %p501_p7 }
 0x2fb   :  { %509 = shalt.err (!%p506_p9)
}
 0x2fc   :  { %363 = dma.vmem_to_hbm [thread:$0]  %s361_s6, 64, %s586_s2, [#allocation4]  }
 0x2fd   :  { %514 = dma.done.wait [#allocation4], 64  }
 0x2fe   :  { %515 = vsyncadd [#allocation4], 4294967232 }
 0x2ff   :  { %367 = vsyncpa [#allocation3], 1 }
 0x300   :  { %368 = vsyncpa [#allocation6], 1 }
 0x301   :  { %369 = vsyncpa [#allocation4], 1 }

</bundles_post_ra>
